<compile_context>
chip_gen: v7x
topology: tpu7x:2x2x1
jax: 0.10.0
libtpu: 0.0.40
codegen_flags: <defaults>
</compile_context>

<pallas_src>
import functools
import math

import jax
import jax.numpy as jnp
from jax import lax
from jax.experimental import pallas as pl
from jax.experimental.pallas import tpu as pltpu


_COLS = 128          # lane dimension
_ROW_ALIGN = 16      # (16,128) keeps both f32 and bf16 blocks tile-aligned
_TILE_R_MAX = 8192   # 8192 x 128 x 4 B = 4 MiB per f32 input block
_CHUNK_R_MAX = 512   # inner-loop chunk: 512 x 128 f32 = 64 vregs streamed
_NUM_CORES = 2       # leading "parallel" grid axis (dual-TC on v7x)
_VMEM_LIMIT_BYTES = 40 << 20


def _make_focal_loss_kernel(gamma: float, tile_r: int, chunk_r: int, cols: int,
                            num_tiles: int, tiles_per_core: int, total: int,
                            needs_mask: bool, soft_mask: bool):
    """Build the streaming elementwise-loss + partial-sum kernel."""
    gamma = float(gamma)            # plain Python float -> folded literal
    n_chunks = tile_r // chunk_r

    def _elem_loss(x_raw, m_raw):
        x = x_raw.astype(jnp.float32)
        m = m_raw.astype(jnp.float32)

        # Shared softplus term t = log1p(exp(-|x|)).
        t = jnp.log1p(jnp.exp(-jnp.abs(x)))

        # Stable BCE-with-logits (identical to the PyTorch formulation):
        #   x - x*m + max(-x,0) + log(exp(-max)+exp(-x-max))
        #   == max(x,0) - x*m + log1p(exp(-|x|))
        bce = jnp.maximum(x, 0.0) - x * m + t

        # invprobs = logsigmoid(z) = min(z,0) - log1p(exp(-|z|)),
        # with z = -x*(2m-1).  For binary masks |z| == |x|, so t is reused.
        z = -x * (m * 2.0 - 1.0)
        tz = jnp.log1p(jnp.exp(-jnp.abs(z))) if soft_mask else t
        invprobs = jnp.minimum(z, 0.0) - tz

        return jnp.exp(invprobs * gamma) * bce

    def _chunk_sum(loss_chunk):
        # (chunk_r, cols) -> (8, cols): layout-preserving reshape + VPU adds
        # (no XLU cross-lane reduce per chunk).
        return jnp.sum(loss_chunk.reshape(chunk_r // 8, 8, cols), axis=0)

    def _accum_tile(x_ref, m_ref, g, masked: bool):
        """Walk the tile in row chunks; return an (8, cols) partial sum."""
        def body(ci, acc):
            r0 = pl.multiple_of(ci * chunk_r, chunk_r)
            loss = _elem_loss(x_ref[pl.ds(r0, chunk_r), :],
                              m_ref[pl.ds(r0, chunk_r), :])
            if masked:
                # Only the tile containing the end of the data is masked.
                # NOTE: keep this a select (jnp.where), not a multiply —
                # out-of-range garbage can be Inf/NaN after exp.
                row = lax.broadcasted_iota(jnp.int32, (chunk_r, cols), 0)
                col = lax.broadcasted_iota(jnp.int32, (chunk_r, cols), 1)
                idx = (g * tile_r + r0 + row) * cols + col   # global elem idx
                loss = jnp.where(idx < total, loss, 0.0)
            return acc + _chunk_sum(loss)

        return lax.fori_loop(0, n_chunks, body,
                             jnp.zeros((8, cols), jnp.float32))

    def kernel(x_ref, m_ref, o_ref):
        c = pl.program_id(0)                 # core (parallel) axis
        i = pl.program_id(1)                 # reduction axis within the core
        g = c * tiles_per_core + i           # global tile index

        @pl.when(i == 0)
        def _():
            o_ref[...] = jnp.zeros_like(o_ref)

        if needs_mask:
            @pl.when(g < num_tiles - 1)
            def _():
                o_ref[...] += _accum_tile(x_ref, m_ref, g, masked=False)

            @pl.when(g == num_tiles - 1)
            def _():
                o_ref[...] += _accum_tile(x_ref, m_ref, g, masked=True)
        else:
            @pl.when(g < num_tiles)
            def _():
                o_ref[...] += _accum_tile(x_ref, m_ref, g, masked=False)
        # Tiles with g >= num_tiles are phantom core-padding tiles: skipped.

    return kernel


@functools.partial(jax.jit, static_argnames=("gamma", "soft_mask"))
def focal_loss(output, mask, gamma: float, soft_mask: bool = False):
    """Pallas implementation of FocalLoss(gamma).forward(output, mask).

    soft_mask=False (default) assumes a binary {0,1} mask (exact reuse of the
    shared softplus term); set soft_mask=True for fractional / soft labels.
    """
    out = jnp.squeeze(output, axis=1)        # (N, 1, H, W) -> (N, H, W)
    assert out.shape == mask.shape
    total = int(out.size)

    # Logits: keep f32/bf16 native (cast happens in-kernel for bf16).
    x = out if out.dtype in (jnp.float32, jnp.bfloat16) else out.astype(
        jnp.float32)
    x = x.reshape(-1)
    # Mask: bool/int masks streamed as bf16 (exact for {0,1}, halves traffic).
    if mask.dtype in (jnp.float32, jnp.bfloat16):
        m = mask.reshape(-1)
    else:
        m = mask.astype(jnp.bfloat16).reshape(-1)

    min_elems = _ROW_ALIGN * _COLS           # 2048
    if total % _COLS != 0 or total < min_elems:
        # Rare / tiny fallback: pad so the flat -> (rows, 128) reshape exists.
        padded = max(min_elems, pl.cdiv(total, _COLS) * _COLS)
        x = jnp.pad(x, (0, padded - total))
        m = jnp.pad(m, (0, padded - total))
        rows = padded // _COLS
    else:
        rows = total // _COLS                # metadata-only reshape below

    x = x.reshape(rows, _COLS)
    m = m.reshape(rows, _COLS)

    tile_r = min(_TILE_R_MAX, (rows // _ROW_ALIGN) * _ROW_ALIGN)
    chunk_r = math.gcd(tile_r, _CHUNK_R_MAX)           # divides tile_r, %8==0
    num_tiles = pl.cdiv(rows, tile_r)
    tiles_per_core = pl.cdiv(num_tiles, _NUM_CORES)
    needs_mask = (num_tiles * tile_r * _COLS) != total
    # Valid elems in the last data tile are masked in-kernel against `total`,
    # covering both pad zeros and uneven-grid garbage rows.

    kernel = _make_focal_loss_kernel(float(gamma), tile_r, chunk_r, _COLS,
                                     num_tiles, tiles_per_core, total,
                                     needs_mask, bool(soft_mask))

    def in_map(c, i):
        g = c * tiles_per_core + i
        # Clamp phantom (core-padding) tiles to the last real tile; their
        # compute is skipped inside the kernel.
        return (jnp.minimum(g, num_tiles - 1), 0)

    n_transc = (5 if soft_mask else 3) * total
    cost = pl.CostEstimate(
        flops=15 * total,
        transcendentals=n_transc,
        bytes_accessed=(x.size * x.dtype.itemsize + m.size * m.dtype.itemsize
                        + _NUM_CORES * 8 * _COLS * 4),
    )

    partial = pl.pallas_call(
        kernel,
        out_shape=jax.ShapeDtypeStruct((_NUM_CORES, 8, _COLS), jnp.float32),
        grid_spec=pltpu.PrefetchScalarGridSpec(
            num_scalar_prefetch=0,
            grid=(_NUM_CORES, tiles_per_core),
            in_specs=[
                pl.BlockSpec((tile_r, _COLS), in_map),
                pl.BlockSpec((tile_r, _COLS), in_map),
            ],
            out_specs=pl.BlockSpec((None, 8, _COLS), lambda c, i: (c, 0, 0)),
        ),
        compiler_params=pltpu.CompilerParams(
            dimension_semantics=("parallel", "arbitrary"),
            vmem_limit_bytes=_VMEM_LIMIT_BYTES,
        ),
        cost_estimate=cost,
    )(x, m)

    # Single tiny cross-lane reduce + mean normalization outside the kernel.
    return jnp.sum(partial) / jnp.float32(total)


def _focal_loss_ref(output, mask, gamma):
    """Pure-JAX reference mirroring the PyTorch forward exactly."""
    out = jnp.squeeze(output, axis=1).astype(jnp.float32)
    mask = mask.astype(jnp.float32)
    max_val = jnp.maximum(-out, 0.0)
    loss = out - out * mask + max_val + jnp.log(
        jnp.exp(-max_val) + jnp.exp(-out - max_val))
    z = -out * (mask * 2.0 - 1.0)
    invprobs = jnp.minimum(z, 0.0) - jnp.log1p(jnp.exp(-jnp.abs(z)))
    loss = jnp.exp(invprobs * gamma) * loss
    return jnp.mean(loss)


if __name__ == "__main__":
    key = jax.random.PRNGKey(0)
    gamma = 2.0

    # Case 1: total=512  -> tiny / padded path (masked last tile).
    # Case 2: total=2048 -> aligned, no pad, no mask.
    # Case 3: total=2560 -> uneven grid, both cores active, masked last tile.
    # Case 4: bool mask  -> bf16 mask-stream path.
    cases = [
        ((2, 1, 16, 16), "f32"),
        ((2, 1, 32, 32), "f32"),
        ((2, 1, 40, 32), "f32"),
        ((2, 1, 32, 32), "bool"),
    ]
    for (N, C, H, W), mask_kind in cases:
        key, k1, k2 = jax.random.split(key, 3)
        output = jax.random.normal(k1, (N, C, H, W), dtype=jnp.float32)
        mask_b = jax.random.bernoulli(k2, p=0.5, shape=(N, H, W))
        mask = mask_b if mask_kind == "bool" else mask_b.astype(jnp.float32)

        loss = jax.block_until_ready(focal_loss(output, mask, gamma))
        ref = _focal_loss_ref(output, mask, gamma)
        assert jnp.allclose(loss, ref, rtol=1e-4, atol=1e-6), (loss, ref)

    print("KERNEL_OK")
</pallas_src>

<mosaic_0001>
module attributes {stable_mosaic.version = 11 : i64} {
  func.func @kernel(%arg0: i32, %arg1: i32, %arg2: memref<16x128xf32, #tpu.memory_space<vmem>>, %arg3: memref<16x128xf32, #tpu.memory_space<vmem>>, %arg4: memref<1x8x128xf32, #tpu.memory_space<vmem>>) attributes {dimension_semantics = [#tpu.dimension_semantics<parallel>, #tpu.dimension_semantics<arbitrary>], iteration_bounds = array<i64: 2, 1>, scalar_prefetch = 0 : i64, scratch_operands = 0 : i64, tpu.core_type = #tpu.core_type<tc>, window_params = [{transform_indices = @transform_0, window_bounds = array<i64: 16, 128>}, {transform_indices = @transform_1, window_bounds = array<i64: 16, 128>}, {transform_indices = @transform_2, window_bounds = array<i64: 1, 8, 128>}]} {
    %c1_i32 = arith.constant 1 : i32
    %0 = arith.muli %arg0, %c1_i32 : i32
    %1 = arith.addi %0, %arg1 : i32
    %c0_i32 = arith.constant 0 : i32
    %2 = arith.cmpi eq, %arg1, %c0_i32 : i32
    %3 = arith.extui %2 : i1 to i32
    %c0_i32_0 = arith.constant 0 : i32
    %4 = arith.cmpi ne, %3, %c0_i32_0 : i32
    scf.if %4 {
      %cst = arith.constant 0.000000e+00 : f32
      %11 = vector.broadcast %cst : f32 to vector<8x128xf32>
      %c0 = arith.constant 0 : index
      %c0_5 = arith.constant 0 : index
      %c0_6 = arith.constant 0 : index
      %12 = vector.load %arg4[%c0, %c0_5, %c0_6] : memref<1x8x128xf32, #tpu.memory_space<vmem>>, vector<1x8x128xf32>
      %13 = vector.shape_cast %12 : vector<1x8x128xf32> to vector<8x128xf32>
      %14 = vector.shape_cast %11 : vector<8x128xf32> to vector<1x8x128xf32>
      tpu.vector_store %arg4[%c0, %c0_5, %c0_6], %14 {strides = array<i32>} : memref<1x8x128xf32, #tpu.memory_space<vmem>>, vector<1x8x128xf32>,
    } else {
    }
    %c0_i32_1 = arith.constant 0 : i32
    %5 = arith.cmpi slt, %1, %c0_i32_1 : i32
    %6 = arith.extui %5 : i1 to i32
    %c0_i32_2 = arith.constant 0 : i32
    %7 = arith.cmpi ne, %6, %c0_i32_2 : i32
    scf.if %7 {
      %c0 = arith.constant 0 : index
      %c0_5 = arith.constant 0 : index
      %c0_6 = arith.constant 0 : index
      %11 = vector.load %arg4[%c0, %c0_5, %c0_6] : memref<1x8x128xf32, #tpu.memory_space<vmem>>, vector<1x8x128xf32>
      %12 = vector.shape_cast %11 : vector<1x8x128xf32> to vector<8x128xf32>
      %cst = arith.constant 0.000000e+00 : f32
      %13 = vector.broadcast %cst : f32 to vector<8x128xf32>
      %c0_i32_7 = arith.constant 0 : i32
      %c16_i32 = arith.constant 16 : i32
      %14 = arith.muli %c0_i32_7, %c16_i32 : i32
      %15 = tpu.assume_multiple %14, 16 : i32
      %16 = arith.index_cast %15 : i32 to index
      %c0_8 = arith.constant 0 : index
      %17 = vector.load %arg2[%16, %c0_8] : memref<16x128xf32, #tpu.memory_space<vmem>>, vector<16x128xf32>
      %18 = arith.index_cast %15 : i32 to index
      %c0_9 = arith.constant 0 : index
      %19 = vector.load %arg3[%18, %c0_9] : memref<16x128xf32, #tpu.memory_space<vmem>>, vector<16x128xf32>
      %20 = math.absf %17 : vector<16x128xf32>
      %cst_10 = arith.constant 0.000000e+00 : f32
      %21 = vector.broadcast %cst_10 : f32 to vector<16x128xf32>
      %22 = arith.subf %21, %20 : vector<16x128xf32>
      %23 = math.exp %22 : vector<16x128xf32>
      %24 = math.log1p %23 : vector<16x128xf32>
      %cst_11 = arith.constant 0.000000e+00 : f32
      %25 = vector.broadcast %cst_11 : f32 to vector<16x128xf32>
      %26 = arith.maximumf %17, %25 : vector<16x128xf32>
      %27 = arith.mulf %17, %19 : vector<16x128xf32>
      %28 = arith.subf %26, %27 : vector<16x128xf32>
      %29 = arith.addf %28, %24 : vector<16x128xf32>
      %cst_12 = arith.constant 0.000000e+00 : f32
      %30 = vector.broadcast %cst_12 : f32 to vector<16x128xf32>
      %31 = arith.subf %30, %17 : vector<16x128xf32>
      %cst_13 = arith.constant 2.000000e+00 : f32
      %32 = vector.broadcast %cst_13 : f32 to vector<16x128xf32>
      %33 = arith.mulf %19, %32 : vector<16x128xf32>
      %cst_14 = arith.constant 1.000000e+00 : f32
      %34 = vector.broadcast %cst_14 : f32 to vector<16x128xf32>
      %35 = arith.subf %33, %34 : vector<16x128xf32>
      %36 = arith.mulf %31, %35 : vector<16x128xf32>
      %cst_15 = arith.constant 0.000000e+00 : f32
      %37 = vector.broadcast %cst_15 : f32 to vector<16x128xf32>
      %38 = arith.minimumf %36, %37 : vector<16x128xf32>
      %39 = arith.subf %38, %24 : vector<16x128xf32>
      %cst_16 = arith.constant 2.000000e+00 : f32
      %40 = vector.broadcast %cst_16 : f32 to vector<16x128xf32>
      %41 = arith.mulf %39, %40 : vector<16x128xf32>
      %42 = math.exp %41 : vector<16x128xf32>
      %43 = arith.mulf %42, %29 : vector<16x128xf32>
      %44 = vector.shape_cast %43 : vector<16x128xf32> to vector<2x8x128xf32>
      %cst_17 = arith.constant dense<0.000000e+00> : vector<8x128xf32>
      %45 = vector.multi_reduction <add>, %44, %cst_17 [0] : vector<2x8x128xf32> to vector<8x128xf32>
      %46 = arith.addf %13, %45 : vector<8x128xf32>
      %c1_i32_18 = arith.constant 1 : i32
      %47 = arith.addf %12, %46 : vector<8x128xf32>
      %c0_19 = arith.constant 0 : index
      %c0_20 = arith.constant 0 : index
      %c0_21 = arith.constant 0 : index
      %48 = vector.load %arg4[%c0_19, %c0_20, %c0_21] : memref<1x8x128xf32, #tpu.memory_space<vmem>>, vector<1x8x128xf32>
      %49 = vector.shape_cast %48 : vector<1x8x128xf32> to vector<8x128xf32>
      %50 = vector.shape_cast %47 : vector<8x128xf32> to vector<1x8x128xf32>
      tpu.vector_store %arg4[%c0_19, %c0_20, %c0_21], %50 {strides = array<i32>} : memref<1x8x128xf32, #tpu.memory_space<vmem>>, vector<1x8x128xf32>,
    } else {
    }
    %c0_i32_3 = arith.constant 0 : i32
    %8 = arith.cmpi eq, %1, %c0_i32_3 : i32
    %9 = arith.extui %8 : i1 to i32
    %c0_i32_4 = arith.constant 0 : i32
    %10 = arith.cmpi ne, %9, %c0_i32_4 : i32
    scf.if %10 {
      %c0 = arith.constant 0 : index
      %c0_5 = arith.constant 0 : index
      %c0_6 = arith.constant 0 : index
      %11 = vector.load %arg4[%c0, %c0_5, %c0_6] : memref<1x8x128xf32, #tpu.memory_space<vmem>>, vector<1x8x128xf32>
      %12 = vector.shape_cast %11 : vector<1x8x128xf32> to vector<8x128xf32>
      %cst = arith.constant 0.000000e+00 : f32
      %13 = vector.broadcast %cst : f32 to vector<8x128xf32>
      %c0_i32_7 = arith.constant 0 : i32
      %c16_i32 = arith.constant 16 : i32
      %14 = arith.muli %c0_i32_7, %c16_i32 : i32
      %15 = tpu.assume_multiple %14, 16 : i32
      %16 = arith.index_cast %15 : i32 to index
      %c0_8 = arith.constant 0 : index
      %17 = vector.load %arg2[%16, %c0_8] : memref<16x128xf32, #tpu.memory_space<vmem>>, vector<16x128xf32>
      %18 = arith.index_cast %15 : i32 to index
      %c0_9 = arith.constant 0 : index
      %19 = vector.load %arg3[%18, %c0_9] : memref<16x128xf32, #tpu.memory_space<vmem>>, vector<16x128xf32>
      %20 = math.absf %17 : vector<16x128xf32>
      %cst_10 = arith.constant 0.000000e+00 : f32
      %21 = vector.broadcast %cst_10 : f32 to vector<16x128xf32>
      %22 = arith.subf %21, %20 : vector<16x128xf32>
      %23 = math.exp %22 : vector<16x128xf32>
      %24 = math.log1p %23 : vector<16x128xf32>
      %cst_11 = arith.constant 0.000000e+00 : f32
      %25 = vector.broadcast %cst_11 : f32 to vector<16x128xf32>
      %26 = arith.maximumf %17, %25 : vector<16x128xf32>
      %27 = arith.mulf %17, %19 : vector<16x128xf32>
      %28 = arith.subf %26, %27 : vector<16x128xf32>
      %29 = arith.addf %28, %24 : vector<16x128xf32>
      %cst_12 = arith.constant 0.000000e+00 : f32
      %30 = vector.broadcast %cst_12 : f32 to vector<16x128xf32>
      %31 = arith.subf %30, %17 : vector<16x128xf32>
      %cst_13 = arith.constant 2.000000e+00 : f32
      %32 = vector.broadcast %cst_13 : f32 to vector<16x128xf32>
      %33 = arith.mulf %19, %32 : vector<16x128xf32>
      %cst_14 = arith.constant 1.000000e+00 : f32
      %34 = vector.broadcast %cst_14 : f32 to vector<16x128xf32>
      %35 = arith.subf %33, %34 : vector<16x128xf32>
      %36 = arith.mulf %31, %35 : vector<16x128xf32>
      %cst_15 = arith.constant 0.000000e+00 : f32
      %37 = vector.broadcast %cst_15 : f32 to vector<16x128xf32>
      %38 = arith.minimumf %36, %37 : vector<16x128xf32>
      %39 = arith.subf %38, %24 : vector<16x128xf32>
      %cst_16 = arith.constant 2.000000e+00 : f32
      %40 = vector.broadcast %cst_16 : f32 to vector<16x128xf32>
      %41 = arith.mulf %39, %40 : vector<16x128xf32>
      %42 = math.exp %41 : vector<16x128xf32>
      %43 = arith.mulf %42, %29 : vector<16x128xf32>
      %44 = tpu.iota {dimensions = array<i32: 0>} : vector<16x128xi32>
      %45 = tpu.iota {dimensions = array<i32: 1>} : vector<16x128xi32>
      %c16_i32_17 = arith.constant 16 : i32
      %46 = arith.muli %1, %c16_i32_17 : i32
      %47 = arith.addi %46, %15 : i32
      %48 = vector.broadcast %47 : i32 to vector<16x128xi32>
      %49 = arith.addi %48, %44 : vector<16x128xi32>
      %c128_i32 = arith.constant 128 : i32
      %50 = vector.broadcast %c128_i32 : i32 to vector<16x128xi32>
      %51 = arith.muli %49, %50 : vector<16x128xi32>
      %52 = arith.addi %51, %45 : vector<16x128xi32>
      %c512_i32 = arith.constant 512 : i32
      %53 = vector.broadcast %c512_i32 : i32 to vector<16x128xi32>
      %54 = arith.cmpi slt, %52, %53 : vector<16x128xi32>
      %cst_18 = arith.constant 0.000000e+00 : f32
      %55 = vector.broadcast %cst_18 : f32 to vector<16x128xf32>
      %56 = arith.select %54, %43, %55 : vector<16x128xi1>, vector<16x128xf32>
      %57 = vector.shape_cast %56 : vector<16x128xf32> to vector<2x8x128xf32>
      %cst_19 = arith.constant dense<0.000000e+00> : vector<8x128xf32>
      %58 = vector.multi_reduction <add>, %57, %cst_19 [0] : vector<2x8x128xf32> to vector<8x128xf32>
      %59 = arith.addf %13, %58 : vector<8x128xf32>
      %c1_i32_20 = arith.constant 1 : i32
      %60 = arith.addf %12, %59 : vector<8x128xf32>
      %c0_21 = arith.constant 0 : index
      %c0_22 = arith.constant 0 : index
      %c0_23 = arith.constant 0 : index
      %61 = vector.load %arg4[%c0_21, %c0_22, %c0_23] : memref<1x8x128xf32, #tpu.memory_space<vmem>>, vector<1x8x128xf32>
      %62 = vector.shape_cast %61 : vector<1x8x128xf32> to vector<8x128xf32>
      %63 = vector.shape_cast %60 : vector<8x128xf32> to vector<1x8x128xf32>
      tpu.vector_store %arg4[%c0_21, %c0_22, %c0_23], %63 {strides = array<i32>} : memref<1x8x128xf32, #tpu.memory_space<vmem>>, vector<1x8x128xf32>,
    } else {
    }
    return
  }
  func.func @transform_0(%arg0: i32, %arg1: i32) -> (i32, i32) {
    %c1_i32 = arith.constant 1 : i32
    %0 = arith.muli %arg0, %c1_i32 : i32
    %1 = arith.addi %0, %arg1 : i32
    %c0_i32 = arith.constant 0 : i32
    %2 = arith.minsi %1, %c0_i32 : i32
    %c0_i32_0 = arith.constant 0 : i32
    %c0_i32_1 = arith.constant 0 : i32
    return %2, %c0_i32_0 : i32, i32
  }
  func.func @transform_1(%arg0: i32, %arg1: i32) -> (i32, i32) {
    %c1_i32 = arith.constant 1 : i32
    %0 = arith.muli %arg0, %c1_i32 : i32
    %1 = arith.addi %0, %arg1 : i32
    %c0_i32 = arith.constant 0 : i32
    %2 = arith.minsi %1, %c0_i32 : i32
    %c0_i32_0 = arith.constant 0 : i32
    %c0_i32_1 = arith.constant 0 : i32
    return %2, %c0_i32_0 : i32, i32
  }
  func.func @transform_2(%arg0: i32, %arg1: i32) -> (i32, i32, i32) {
    %c0_i32 = arith.constant 0 : i32
    %c0_i32_0 = arith.constant 0 : i32
    %c0_i32_1 = arith.constant 0 : i32
    return %arg0, %c0_i32, %c0_i32_0 : i32, i32, i32
  }
}

</mosaic_0001>

<bundles_post_ra>
// kernel: squeeze.1
= control target key start
LH: loop header
LB: loop body
LE: loop exit
PB: predicated region body
PF: predicated region fallthrough
CT: control target
= control target key end

     0   :  { %2 = vsyncpa [#allocation1], 0  ;;  %s96_s6 = smov [#allocation0]   ;;  %s129_s0 = inlined_call_operand.hbm [shape: f32[2,1,16,16], index: 0, kind: input, shape index: {}]   ;;  %s130_s1 = inlined_call_operand.vmem [shape: f32[512], index: 1, kind: output, shape index: {}]  }
   0x1   :  { %s7_s7 = sshll.u32 %s96_s6, 4  ;;  %s72_s10 = scalar_lea.hbm %s129_s0, 512  ;;  %s8_s7 = int_to_ptr.vmem [resolvable:$true] %s7_s7 }
   0x2   :  { %p73_p0 = scmp.ne.s32.totalorder %s129_s0, %s72_s10  ;;  %p76_p1 = scmp.lt.u32.totalorder %s72_s10, %s129_s0 }
   0x4   :  { %p78_p2 = pnand %p76_p1, %p73_p0 }
   0x6   :  { %81 = shalt.err (!%p78_p2)
}
   0x7   :  { %s82_s15 = scalar_lea.vmem %s8_s7, 512  ;;  %p87_p4 = scmp.lt.s32.totalorder %s8_s7, %s8_s7 }
   0x8   :  { %p83_p3 = scmp.ne.s32.totalorder %s8_s7, %s82_s15  ;;  %p88_p5 = scmp.lt.s32.totalorder %s82_s15, %s82_s15 }
   0xa   :  { %p89_p6 = por %p88_p5, %p87_p4 }
   0xc   :  { %p90_p7 = pnand %p89_p6, %p83_p3 }
   0xe   :  { %93 = shalt.err (!%p90_p7)
}
   0xf   :  { %10 = dma.hbm_to_vmem [thread:$0]  %s129_s0, 512, %s8_s7, [#allocation1]  }
  0x10   :  { %94 = dma.done.wait [#allocation1], 512  }
  0x11   :  { %95 = vsyncadd [#allocation1], 4294966784  ;;  %v16_v0 = vld [vmem:[#allocation0 + $0x7] ss:$8 sm:$0xf]   ;;  %s97_s0 = smov 112  }
  0x12   :  { %v28_v1 = vld [vmem:[#allocation0 + $0x5] ss:$8 sm:$0xf]   ;;  %17 = vrot.lane.b32.xlu0 %v16_v0, %s97_s0  ;;  %s98_s18 = smov 80   ;;  %vm13_vm0 = vcmask 130048   ;;  %s99_s19 = smov 96  }
  0x13   :  { %29 = vrot.lane.b32.xlu1 %v28_v1, %s98_s18  ;;  %v22_v2 = vld [vmem:[#allocation0 + $0x6] ss:$8 sm:$0xf]   ;;  %v34_v3 = vld [vmem:[#allocation0 + $0x4] ss:$8 sm:$0xf]  }
  0x14   :  { %v12_v4 = vld [vmem:[#allocation0] ss:$8 sm:$0xf]   ;;  %s100_s20 = smov 64   ;;  %s101_s21 = smov 48   ;;  %vm19_vm1 = vcmask 1048448  }
  0x15   :  { %14 = vst.msk [vmem:[#allocation2] sm:$0xf] %vm13_vm0, %v12_v4   ;;  %v40_v5 = vld [vmem:[#allocation0 + $0x3] ss:$8 sm:$0xf]   ;;  %s102_s22 = smov 32  }
  0x16   :  { %23 = vrot.lane.b32.xlu0 %v22_v2, %s99_s19  ;;  %v46_v6 = vld [vmem:[#allocation0 + $0x2] ss:$8 sm:$0xf]   ;;  %v52_v7 = vld [vmem:[#allocation0 + $0x1] ss:$8 sm:$0xf]  }
  0x17   :  { %35 = vrot.lane.b32.xlu1 %v34_v3, %s100_s20  ;;  %s103_s23 = smov 16   ;;  %vm25_vm2 = vcmask 917248   ;;  %vm31_vm3 = vcmask 786048   ;;  %vm37_vm4 = vcmask 654848   ;;  %vm43_vm5 = vcmask 523648  }
  0x18   :  { %vm49_vm6 = vcmask 392448   ;;  %vm55_vm7 = vcmask 261248  }
  0x1a   :  { %41 = vrot.lane.b32.xlu0 %v40_v5, %s101_s21 }
  0x1b   :  { %47 = vrot.lane.b32.xlu1 %v46_v6, %s102_s22 }
  0x1e   :  { %53 = vrot.lane.b32.xlu0 %v52_v7, %s103_s23 }
  0x84   :  { %v18_v8 = vpop.permute.xlu0 %17  }
  0x85   :  { %v30_v9 = vpop.permute.xlu1 %29   ;;  %20 = vst.msk [vmem:[#allocation2] sm:$0xf] %vm19_vm1, %v18_v8  }
  0x88   :  { %v24_v10 = vpop.permute.xlu0 %23  }
  0x89   :  { %v36_v11 = vpop.permute.xlu1 %35   ;;  %26 = vst.msk [vmem:[#allocation2] sm:$0xf] %vm25_vm2, %v24_v10  }
  0x8a   :  { %32 = vst.msk [vmem:[#allocation2] sm:$0xf] %vm31_vm3, %v30_v9  }
  0x8b   :  { %38 = vst.msk [vmem:[#allocation2] sm:$0xf] %vm37_vm4, %v36_v11  }
  0x8c   :  { %v42_v12 = vpop.permute.xlu0 %41  }
  0x8d   :  { %v48_v13 = vpop.permute.xlu1 %47   ;;  %44 = vst.msk [vmem:[#allocation2] sm:$0xf] %vm43_vm5, %v42_v12  }
  0x8e   :  { %50 = vst.msk [vmem:[#allocation2] sm:$0xf] %vm49_vm6, %v48_v13  }
  0x90   :  { %v54_v14 = vpop.permute.xlu0 %53  }
  0x91   :  { %56 = vst.msk [vmem:[#allocation2] sm:$0xf] %vm55_vm7, %v54_v14  }
  0x98   :  { %v60_v15 = vld [vmem:[#allocation2] sm:$0xf] }
  0x99   :  { %62 = vst [vmem:[%s130_s1] sm:$0xf] %v60_v15 }
  0x9a   :  { %63 = vsyncpa [#allocation1], 1 }

// kernel: focal_loss.1
= control target key start
LH: loop header
LB: loop body
LE: loop exit
PB: predicated region body
PF: predicated region fallthrough
CT: control target
= control target key end

     0   :  { %s559_s9 = smov 0   ;;  %s561_s10 = smov 0   ;;  %s635_s0 = inlined_call_operand.vmem [shape: f32[16,128], index: 0, kind: input, shape index: {}]   ;;  %s636_s1 = inlined_call_operand.vmem [shape: f32[16,128], index: 1, kind: input, shape index: {}]   ;;  %s637_s2 = inlined_call_operand.vmem [shape: f32[2,8,128], index: 2, kind: output, shape index: {}]  }
   0x1   :  { %s563_s11 = smov 0  }
   0x2 LB: > { %s24_s12 = sadd.s32 1, %s537_s10  ;;  %p455_p0 = scmp.ge.s32.totalorder %s541_s11, 1  ;;  %s541_s11 = sphi %s563_s11, %s12_s11   ;;  %s537_s10 = sphi %s561_s10, %s639_s10   ;;  %s533_s9 = sphi %s559_s9, %s638_s9  }
   0x3   : > { %p26_p1 = scmp.ge.s32.totalorder %s24_s12, 2  ;;  %p160_p2 = scmp.lt.s32.totalorder %s541_s11, 3 }
   0x5   : > { %s641_s12 = smov (%p26_p1, %s24_s12), 0  ;;  %p161_p3 = pnand %p455_p0, %p160_p2 }
   0x6   : > { %p193_p4 = scmp.lt.s32.totalorder (!%p161_p3), %s533_s9, 0  ;;  %p216_p5 = scmp.lt.s32.totalorder (!%p161_p3), %s533_s9, 1  ;;  %v543_v0 = vmov (!%p161_p3), 0.0  }
   0x7   : > { %164 = sbr.rel (%p161_p3) target bundleno = 142 (0x8e), region = 28  ;;  %p461_p7 = scmp.ge.s32.totalorder (!%p161_p3), %s533_s9, 0 }
   0xe   : > { %s194_s13 = scalar_select %p193_p4, %s533_s9, 0 }
   0xf   : > { %s217_s14 = scalar_select %p216_p5, %s533_s9, 1 }
  0x10   : > { %s456_s15 = sshll.u32 %s194_s13, 1  ;;  %229 = sbr.rel (%p461_p7) target bundleno = 81 (0x51), region = 36 }
  0x11   : > { %p196_p6 = scmp.lt.s32.totalorder %s456_s15, 1  ;;  %s460_s16 = sshll.u32 %s217_s14, 3 }
  0x12   : > { %s586_s19 = scalar_lea.vmem %s637_s2, %s460_s16 }
  0x13   : > { %s643_s15 = smov (!%p196_p6, %s456_s15), 1  ;;  %225 = vst [vmem:[%s586_s19] sm:$0xff] %v543_v0 }
  0x14   : > { %s457_s20 = sshll.u32 %s643_s15, 3 }
  0x15   : > { %s592_s23 = scalar_lea.vmem %s635_s0, %s457_s20  ;;  %s597_s26 = scalar_lea.vmem %s636_s1, %s457_s20 }
  0x16   : > { %v231_v1 = vld [vmem:[%s592_s23] sm:$0xff] (!%p461_p7)  ;;  %v232_v2 = vld [vmem:[%s592_s23 + $0x8] sm:$0xff] (!%p461_p7) }
  0x17   : > { %v235_v3 = vand.u32 2147483647, %v231_v1  ;;  %v236_v4 = vand.u32 2147483647, %v232_v2  ;;  %v233_v9 = vld [vmem:[%s597_s26] sm:$0xff]  ;;  %v234_v10 = vld [vmem:[%s597_s26 + $0x8] sm:$0xff] }
  0x18   : > { %v271_v14 = vmul.f32 2.0, %v233_v9  ;;  %v272_v16 = vmul.f32 2.0, %v234_v10  ;;  %v269_v19 = vsub.f32 0.0, %v231_v1  ;;  %v270_v21 = vsub.f32 0.0, %v232_v2 }
  0x19   : > { %v237_v5 = vsub.f32 0.0, %v235_v3  ;;  %v238_v6 = vsub.f32 0.0, %v236_v4  ;;  %v261_v44 = vmax.f32 %v231_v1, 0.0  ;;  %v263_v45 = vmul.f32 %v233_v9, %v231_v1 }
  0x1a   : > { %v462_v20 = vadd.f32 -1.0, %v271_v14  ;;  %v463_v22 = vadd.f32 -1.0, %v272_v16  ;;  %v262_v47 = vmax.f32 %v232_v2, 0.0  ;;  %v264_v48 = vmul.f32 %v234_v10, %v232_v2  ;;  %v230_v57 = vld [vmem:[%s586_s19] sm:$0xff] }
  0x1b   : > { %v239_v7 = vmul.f32 1.442695, %v237_v5  ;;  %v241_v8 = vmul.f32 1.442695, %v238_v6  ;;  %v265_v49 = vsub.f32 %v261_v44, %v263_v45 }
  0x1c   : > { %v275_v26 = vmul.f32 %v462_v20, %v269_v19  ;;  %v276_v28 = vmul.f32 %v463_v22, %v270_v21  ;;  %v266_v50 = vsub.f32 %v262_v47, %v264_v48 }
  0x1d   : > { %495 = vpow2.f32 %v239_v7 }
  0x1e   : > { %497 = vpow2.f32 %v241_v8  ;;  %v277_v32 = vmin.f32 %v275_v26, 0.0  ;;  %v278_v35 = vmin.f32 %v276_v28, 0.0 }
  0x27   : > { %v496_v11 = vpop.eup %495 }
  0x28   : > { %v498_v12 = vpop.eup %497  ;;  %v243_v13 = vadd.f32 1.0, %v496_v11  ;;  %v246_v17 = vmul.f32 -0.5, %v496_v11  ;;  %v249_v24 = vand.u32 2147483647, %v496_v11 }
  0x29   : > { %v252_v15 = vadd.f32 1.0, %v498_v12  ;;  %v255_v18 = vmul.f32 -0.5, %v498_v12  ;;  %v258_v27 = vand.u32 2147483647, %v498_v12 }
  0x2a   : > { %499 = vlog2.f32 %v243_v13  ;;  %v247_v23 = vadd.f32 1.0, %v246_v17  ;;  %vm250_vm0 = vcmp.lt.f32.partialorder %v249_v24, 0.0004427343 }
  0x2b   : > { %501 = vlog2.f32 %v252_v15  ;;  %v256_v25 = vadd.f32 1.0, %v255_v18  ;;  %vm259_vm1 = vcmp.lt.f32.partialorder %v258_v27, 0.0004427343 }
  0x2c   : > { %v248_v29 = vmul.f32 %v496_v11, %v247_v23 }
  0x2d   : > { %v257_v31 = vmul.f32 %v498_v12, %v256_v25 }
  0x34   : > { %v500_v30 = vpop.eup %499 }
  0x35   : > { %v502_v33 = vpop.eup %501  ;;  %v245_v34 = vmul.f32 0.6931472, %v500_v30 }
  0x36   : > { %v254_v36 = vmul.f32 0.6931472, %v502_v33 }
  0x37   : > { %v251_v37 = vsel %vm250_vm0, %v248_v29, %v245_v34 }
  0x38   : > { %v260_v38 = vsel %vm259_vm1, %v257_v31, %v254_v36  ;;  %v279_v39 = vsub.f32 %v277_v32, %v251_v37  ;;  %v267_v51 = vadd.f32 %v265_v49, %v251_v37 }
  0x39   : > { %v280_v40 = vsub.f32 %v278_v35, %v260_v38  ;;  %v268_v52 = vadd.f32 %v266_v50, %v260_v38 }
  0x3a   : > { %v281_v41 = vmul.f32 2.0, %v279_v39 }
  0x3b   : > { %v282_v42 = vmul.f32 2.0, %v280_v40 }
  0x3c   : > { %v283_v43 = vmul.f32 1.442695, %v281_v41 }
  0x3d   : > { %v285_v46 = vmul.f32 1.442695, %v282_v42 }
  0x3e   : > { %503 = vpow2.f32 %v283_v43 }
  0x3f   : > { %505 = vpow2.f32 %v285_v46 }
  0x48   : > { %v504_v53 = vpop.eup %503 }
  0x49   : > { %v506_v54 = vpop.eup %505  ;;  %v287_v55 = vmul.f32 %v504_v53, %v267_v51 }
  0x4a   : > { %v288_v56 = vmul.f32 %v506_v54, %v268_v52 }
  0x4c   : > { %v289_v58 = vadd.f32 %v288_v56, %v287_v55 }
  0x4e   : > { %v291_v59 = vadd.f32 %v289_v58, %v230_v57 }
  0x50   : > { %292 = vst [vmem:[%s586_s19] sm:$0xff] %v291_v59 }
  0x51 PF: > { %p464_p8 = scmp.ne.s32.totalorder %s533_s9, 0 }
  0x52   : > { %v608_v60 = vld [vmem:[%s592_s23] sm:$0xff] (!%p464_p8)  ;;  %v611_v61 = vld [vmem:[%s592_s23 + $0x8] sm:$0xff] (!%p464_p8)  ;;  %v356_v24 = vlaneseq (!%p464_p8)  ;;  %s467_s27 = sshll.u32 (!%p464_p8), %s533_s9, 4 }
  0x53   : > { %296 = sbr.rel (%p464_p8) target bundleno = 142 (0x8e), region = 40  ;;  %v302_v62 = vand.u32 (!%p464_p8), 2147483647, %v608_v60  ;;  %v303_v63 = vand.u32 (!%p464_p8), 2147483647, %v611_v61  ;;  %v300_v4 = vld [vmem:[%s597_s26] sm:$0xff] (!%p464_p8)  ;;  %v363_v39 = vstv (!%p464_p8), %s467_s27 }
  0x54   : > { %v301_v5 = vld [vmem:[%s597_s26 + $0x8] sm:$0xff] (!%p464_p8)  ;;  %v338_v9 = vmul.f32 (!%p464_p8), 2.0, %v300_v4  ;;  %v336_v14 = vsub.f32 (!%p464_p8), 0.0, %v608_v60  ;;  %v337_v16 = vsub.f32 (!%p464_p8), 0.0, %v611_v61  ;;  %v357_v32 = vshrl.u32 (!%p464_p8), %v356_v24, 7 }
  0x55   : > { %v304_v0 = vsub.f32 (!%p464_p8), 0.0, %v302_v62  ;;  %v305_v1 = vsub.f32 (!%p464_p8), 0.0, %v303_v63  ;;  %v339_v11 = vmul.f32 (!%p464_p8), 2.0, %v301_v5  ;;  %v328_v44 = vmax.f32 (!%p464_p8), %v608_v60, 0.0 }
  0x56   : > { %v465_v15 = vadd.f32 (!%p464_p8), -1.0, %v338_v9  ;;  %v358_v38 = vadd.s32 (!%p464_p8), 8, %v357_v32  ;;  %v364_v43 = vadd.s32 (!%p464_p8), %v363_v39, %v357_v32  ;;  %v330_v45 = vmul.f32 (!%p464_p8), %v300_v4, %v608_v60 }
  0x57   : > { %v306_v2 = vmul.f32 (!%p464_p8), 1.442695, %v304_v0  ;;  %v308_v3 = vmul.f32 (!%p464_p8), 1.442695, %v305_v1  ;;  %v466_v17 = vadd.f32 (!%p464_p8), -1.0, %v339_v11  ;;  %v329_v48 = vmax.f32 (!%p464_p8), %v611_v61, 0.0 }
  0x58   : > { %v342_v21 = vmul.f32 (!%p464_p8), %v465_v15, %v336_v14  ;;  %v365_v47 = vadd.s32 (!%p464_p8), %v363_v39, %v358_v38  ;;  %v331_v49 = vmul.f32 (!%p464_p8), %v301_v5, %v611_v61  ;;  %v360_v50 = vand.u32 (!%p464_p8), 127, %v356_v24  ;;  %v297_v0 = vld [vmem:[%s586_s19] sm:$0xff] (!%p464_p8) }
  0x59   : > { %507 = vpow2.f32 (!%p464_p8), %v306_v2  ;;  %v343_v23 = vmul.f32 (!%p464_p8), %v466_v17, %v337_v16  ;;  %v366_v51 = vmul.u32 (!%p464_p8), 128, %v364_v43  ;;  %v332_v52 = vsub.f32 (!%p464_p8), %v328_v44, %v330_v45 }
  0x5a   : > { %509 = vpow2.f32 %v308_v3  ;;  %v344_v28 = vmin.f32 %v342_v21, 0.0  ;;  %v367_v53 = vmul.u32 128, %v365_v47  ;;  %v333_v54 = vsub.f32 %v329_v48, %v331_v49 }
  0x5b   : > { %v345_v31 = vmin.f32 %v343_v23, 0.0  ;;  %v368_v55 = vadd.s32 %v366_v51, %v360_v50 }
  0x5c   : > { %v369_v57 = vadd.s32 %v367_v53, %v360_v50 }
  0x5d   : > { %vm370_vm4 = vcmp.lt.s32.totalorder %v368_v55, 512 }
  0x5e   : > { %vm371_vm5 = vcmp.lt.s32.totalorder %v369_v57, 512 }
  0x63   : > { %v508_v6 = vpop.eup %507 }
  0x64   : > { %v510_v7 = vpop.eup %509  ;;  %v310_v8 = vadd.f32 1.0, %v508_v6  ;;  %v313_v12 = vmul.f32 -0.5, %v508_v6  ;;  %v316_v19 = vand.u32 2147483647, %v508_v6 }
  0x65   : > { %v319_v10 = vadd.f32 1.0, %v510_v7  ;;  %v322_v13 = vmul.f32 -0.5, %v510_v7  ;;  %v325_v22 = vand.u32 2147483647, %v510_v7 }
  0x66   : > { %511 = vlog2.f32 %v310_v8  ;;  %v314_v18 = vadd.f32 1.0, %v313_v12  ;;  %vm317_vm2 = vcmp.lt.f32.partialorder %v316_v19, 0.0004427343 }
  0x67   : > { %513 = vlog2.f32 %v319_v10  ;;  %v323_v20 = vadd.f32 1.0, %v322_v13  ;;  %vm326_vm3 = vcmp.lt.f32.partialorder %v325_v22, 0.0004427343 }
  0x68   : > { %v315_v25 = vmul.f32 %v508_v6, %v314_v18 }
  0x69   : > { %v324_v27 = vmul.f32 %v510_v7, %v323_v20 }
  0x70   : > { %v512_v26 = vpop.eup %511 }
  0x71   : > { %v514_v29 = vpop.eup %513  ;;  %v312_v30 = vmul.f32 0.6931472, %v512_v26 }
  0x72   : > { %v321_v33 = vmul.f32 0.6931472, %v514_v29 }
  0x73   : > { %v318_v34 = vsel %vm317_vm2, %v315_v25, %v312_v30 }
  0x74   : > { %v327_v35 = vsel %vm326_vm3, %v324_v27, %v321_v33  ;;  %v346_v36 = vsub.f32 %v344_v28, %v318_v34  ;;  %v334_v56 = vadd.f32 %v332_v52, %v318_v34 }
  0x75   : > { %v347_v37 = vsub.f32 %v345_v31, %v327_v35  ;;  %v335_v58 = vadd.f32 %v333_v54, %v327_v35 }
  0x76   : > { %v348_v40 = vmul.f32 2.0, %v346_v36 }
  0x77   : > { %v349_v41 = vmul.f32 2.0, %v347_v37 }
  0x78   : > { %v350_v42 = vmul.f32 1.442695, %v348_v40 }
  0x79   : > { %v352_v46 = vmul.f32 1.442695, %v349_v41 }
  0x7a   : > { %515 = vpow2.f32 %v350_v42 }
  0x7b   : > { %517 = vpow2.f32 %v352_v46 }
  0x84   : > { %v516_v59 = vpop.eup %515 }
  0x85   : > { %v518_v60 = vpop.eup %517  ;;  %v354_v62 = vmul.f32 %v516_v59, %v334_v56 }
  0x86   : > { %v355_v63 = vmul.f32 %v518_v60, %v335_v58 }
  0x87   : > { %v372_v61 = vsel %vm370_vm4, %v354_v62, 0.0 }
  0x88   : > { %v373_v1 = vsel %vm371_vm5, %v355_v63, 0.0 }
  0x89   : > { %v374_v2 = vadd.f32 %v373_v1, %v372_v61 }
  0x8b   : > { %v376_v3 = vadd.f32 %v374_v2, %v297_v0 }
  0x8d   : > { %377 = vst [vmem:[%s586_s19] sm:$0xff] %v376_v3 }
  0x8e PF: > { %s12_s11 = sadd.s32 1, %s541_s11   ;;  %s638_s9 = smov %s537_s10 }
  0x8f   : > { %p9_p9 = scmp.ge.s32.totalorder %s12_s11, 4   ;;  %s639_s10 = smov %s641_s12 }
  0x91   :  { %11 = sbr.rel (!%p9_p9) target bundleno = 2 (0x2), region = 73 }

</bundles_post_ra>
